<compile_context>
chip_gen: v6e
topology: v6e:2x2x1
jax: 0.10.0
libtpu: 0.0.40
codegen_flags: <defaults>
</compile_context>

<pallas_src>
import functools
import math

import jax
import jax.numpy as jnp
from jax import lax
from jax.experimental import pallas as pl
from jax.experimental.pallas import tpu as pltpu

# ~2 MiB of native-dtype bytes per input block (size by bytes, not elements).
_TARGET_BLOCK_BYTES = 2 * 1024 * 1024
# Explicit scoped-VMEM request: covers 2 inputs x 2 buffers x 2 MiB + scratch
# with headroom; within physical VMEM on v5e/v6e (128 MiB) and v7x (64 MiB).
_VMEM_LIMIT_BYTES = 32 * 1024 * 1024


def _sublane_multiple(dtype) -> int:
    """Sublane alignment for the block's second-to-last dim (8/16/32 by width)."""
    itemsize = jnp.dtype(dtype).itemsize
    return {4: 8, 2: 16, 1: 32}.get(itemsize, 8)


def _wrmse_kernel(x_ref, xhat_ref, w_ref, out_ref, acc_ref, *,
                  block_b: int, blocks_per_split: int, grid_b: int,
                  total_b: int, has_overhang: bool):
    c = pl.program_id(0)                 # split ("parallel"; one per TC on v7x)
    j = pl.program_id(1)                 # block within the split ("arbitrary")
    blk = c * blocks_per_split + j       # global block index (may overhang)

    @pl.when(j == 0)
    def _init():
        acc_ref[...] = jnp.zeros_like(acc_ref)

    x = x_ref[...].astype(jnp.float32)
    xh = xhat_ref[...].astype(jnp.float32)
    d = x - xh
    sq = d * d                           # weight multiply deferred to finalize

    def _fold(v):
        # Fold the block into the small accumulator with sublane-aligned VPU
        # adds; the reshape splits exactly on the 8-sublane tile boundary, so
        # it is a free view (no VMEM copy).
        if block_b % 8 == 0:
            return v.reshape(block_b // 8, 8, -1).sum(axis=0)
        return jnp.sum(v, axis=0, keepdims=True)

    ragged = (total_b % block_b) != 0

    if ragged or has_overhang:
        # Unmasked fast path for every full block; the iota/compare/select
        # tail mask only runs on the single ragged block.  Overhang blocks
        # (blk >= grid_b, clamped DMA) contribute nothing.
        full_limit = grid_b - 1 if ragged else grid_b

        @pl.when(blk < full_limit)
        def _full_block():
            acc_ref[...] += _fold(sq)

        if ragged:
            @pl.when(blk == grid_b - 1)
            def _partial_block():
                row = blk * block_b + lax.broadcasted_iota(jnp.int32, sq.shape, 0)
                # Select (not multiply) BEFORE accumulation so garbage in the
                # padded rows (possibly NaN/Inf) never propagates.
                acc_ref[...] += _fold(jnp.where(row < total_b, sq, 0.0))
    else:
        acc_ref[...] += _fold(sq)

    @pl.when(j == blocks_per_split - 1)
    def _finalize():
        # Apply the deferred weight exactly once per split, reduce to a scalar
        # partial sum and write it into this split's lane-dense output block.
        col = jnp.sum(acc_ref[...], axis=0, keepdims=True)   # (1, m_lane)
        partial = jnp.sum(w_ref[...] * col)
        out_ref[...] = jnp.full(out_ref.shape, partial, out_ref.dtype)


def wrmse(x: jax.Array, xhat: jax.Array, w: jax.Array, *,
          normalize: bool = True, block_rows=None) -> jax.Array:
    """sqrt(mean(w * (x - xhat)**2)) with w broadcast over leading dims of x."""
    assert x.shape == xhat.shape, "x and xhat must have the same shape"
    rank = w.ndim
    assert x.shape[x.ndim - rank:] == tuple(w.shape), \
        "trailing dims of x must match w.shape"

    m = math.prod(w.shape)
    b = x.size // max(m, 1)
    n_total = x.size

    # Weight prep matches the torch module: optional normalization, float32.
    w32 = w.astype(jnp.float32)
    if normalize:
        w32 = w32 / jnp.sum(w32)
    w2 = w32.reshape(1, m)

    # Lane-dense layout: if the weighted row is shorter than / misaligned with
    # a 128-lane tile, fold k consecutive rows into one row (free contiguous
    # view of x / xhat; w is tiled so lane j uses w[j % m]).
    if m % 128 == 0:
        k = 1
    else:
        k = 128 // math.gcd(m, 128)
        if k > 1 and b % k != 0:
            # TODO(synk): support ragged lane-folds (needs a lane tail mask);
            # fall back to the unfolded (lane-padded) layout.
            k = 1
    m_lane = k * m
    b_rows = b // k
    if k > 1:
        w2 = jnp.tile(w2, (1, k))

    # Free, contiguous reshapes: inputs go to the kernel in native dtype.
    x2 = x.reshape(b_rows, m_lane)
    xh2 = xhat.reshape(b_rows, m_lane)

    itemsize = jnp.dtype(x.dtype).itemsize
    sub = _sublane_multiple(x.dtype)
    if block_rows is None:
        rows = _TARGET_BLOCK_BYTES // max(m_lane * itemsize, 1)
        block_rows = max(sub, (rows // sub) * sub)
    block_b = b_rows if b_rows <= block_rows else block_rows
    grid_b = pl.cdiv(b_rows, block_b)

    # Split the block range across 2 "parallel" grid slots (v7x: one per TC);
    # on 1-TC chips the two splits simply run back-to-back.
    n_splits = 2 if grid_b >= 2 else 1
    blocks_per_split = pl.cdiv(grid_b, n_splits)
    has_overhang = (n_splits * blocks_per_split) != grid_b

    acc_rows = 8 if block_b % 8 == 0 else 1

    if has_overhang:
        def in_map(c, j):
            # Clamp overhang steps to the last real block (their contribution
            # is skipped in-kernel); keeps the DMA in range.
            return (jnp.minimum(c * blocks_per_split + j, grid_b - 1), 0)
    else:
        def in_map(c, j):
            return (c * blocks_per_split + j, 0)

    kernel = functools.partial(
        _wrmse_kernel, block_b=block_b, blocks_per_split=blocks_per_split,
        grid_b=grid_b, total_b=b_rows, has_overhang=has_overhang)

    cost = pl.CostEstimate(
        flops=3 * n_total + 2 * m_lane * n_splits,
        transcendentals=0,
        bytes_accessed=2 * x2.size * itemsize + m_lane * 4 + n_splits * 128 * 4)

    out = pl.pallas_call(
        kernel,
        out_shape=jax.ShapeDtypeStruct((1, n_splits * 128), jnp.float32),
        grid_spec=pltpu.PrefetchScalarGridSpec(
            num_scalar_prefetch=0,
            grid=(n_splits, blocks_per_split),
            in_specs=[
                pl.BlockSpec((block_b, m_lane), in_map),
                pl.BlockSpec((block_b, m_lane), in_map),
                pl.BlockSpec((1, m_lane), lambda c, j: (0, 0)),  # resident weight
            ],
            out_specs=pl.BlockSpec((1, 128), lambda c, j: (0, c)),
            scratch_shapes=[pltpu.VMEM((acc_rows, m_lane), jnp.float32)],
        ),
        compiler_params=pltpu.CompilerParams(
            dimension_semantics=("parallel", "arbitrary"),
            vmem_limit_bytes=_VMEM_LIMIT_BYTES,
        ),
        cost_estimate=cost,
    )(x2, xh2, w2)

    # Each split filled its 128-lane block with its scalar partial sum; combine,
    # normalize by the element count, and take the root in the wrapper.
    partials = out[0, ::128]
    return jnp.sqrt(jnp.sum(partials) / jnp.float32(n_total))


def _wrmse_reference(x, xhat, w, normalize=True):
    w = w.astype(jnp.float32)
    if normalize:
        w = w / jnp.sum(w)
    d = x.astype(jnp.float32) - xhat.astype(jnp.float32)
    return jnp.sqrt(jnp.mean(w * d * d))


if __name__ == "__main__":
    key = jax.random.PRNGKey(0)
    kx, kh, kw, kx2, kh2, kx3, kh3, kw2, kx4, kh4 = jax.random.split(key, 10)

    # Weight over the trailing (16, 16) dims; x / xhat carry leading batch dims.
    w = jax.random.uniform(kw, (16, 16), dtype=jnp.float32, minval=0.1, maxval=1.0)
    x = jax.random.normal(kx, (2, 4, 16, 16), dtype=jnp.float32)
    xhat = jax.random.normal(kh, (2, 4, 16, 16), dtype=jnp.float32)

    out = jax.block_until_ready(wrmse(x, xhat, w, normalize=True))
    ref = jax.block_until_ready(_wrmse_reference(x, xhat, w, normalize=True))
    assert out.shape == (), f"expected scalar, got {out.shape}"
    assert jnp.isfinite(out), "kernel result is not finite"
    assert jnp.allclose(out, ref, rtol=1e-5, atol=1e-6), (out, ref)

    # Multi-block grid + ragged-tail mask + 2-way split (B=15, block=8 -> 2 blocks).
    x3 = jax.random.normal(kx2, (3, 5, 16, 16), dtype=jnp.float32)
    xh3 = jax.random.normal(kh2, (3, 5, 16, 16), dtype=jnp.float32)
    out2 = jax.block_until_ready(wrmse(x3, xh3, w, block_rows=8))
    ref2 = _wrmse_reference(x3, xh3, w)
    assert jnp.allclose(out2, ref2, rtol=1e-5, atol=1e-6), (out2, ref2)

    # Odd block count (B=23, block=8 -> 3 blocks): exercises the clamped
    # overhang step on the second split plus the ragged tail.
    x5 = jax.random.normal(kx3, (23, 16, 16), dtype=jnp.float32)
    xh5 = jax.random.normal(kh3, (23, 16, 16), dtype=jnp.float32)
    out5 = jax.block_until_ready(wrmse(x5, xh5, w, block_rows=8))
    ref5 = _wrmse_reference(x5, xh5, w)
    assert jnp.allclose(out5, ref5, rtol=1e-5, atol=1e-6), (out5, ref5)

    # Un-normalized weights path.
    out3 = jax.block_until_ready(wrmse(x, xhat, w, normalize=False))
    ref3 = _wrmse_reference(x, xhat, w, normalize=False)
    assert jnp.allclose(out3, ref3, rtol=1e-5, atol=1e-6), (out3, ref3)

    # Small / lane-misaligned weight (m=32): exercises the lane-dense row fold.
    w_small = jax.random.uniform(kw2, (32,), dtype=jnp.float32, minval=0.1, maxval=1.0)
    x6 = jax.random.normal(kx4, (2, 4, 32), dtype=jnp.float32)
    xh6 = jax.random.normal(kh4, (2, 4, 32), dtype=jnp.float32)
    out6 = jax.block_until_ready(wrmse(x6, xh6, w_small))
    ref6 = _wrmse_reference(x6, xh6, w_small)
    assert jnp.allclose(out6, ref6, rtol=1e-5, atol=1e-6), (out6, ref6)

    # bf16 inputs: byte-sized blocks pick up 2x rows; math is done in f32.
    xb = x.astype(jnp.bfloat16)
    xhb = xhat.astype(jnp.bfloat16)
    out7 = jax.block_until_ready(wrmse(xb, xhb, w))
    ref7 = _wrmse_reference(xb, xhb, w)
    assert jnp.allclose(out7, ref7, rtol=1e-5, atol=1e-6), (out7, ref7)

    print("KERNEL_OK")
</pallas_src>

<mosaic_0001>
module attributes {stable_mosaic.version = 11 : i64} {
  func.func @_wrmse_kernel(%arg0: i32, %arg1: i32, %arg2: memref<8x256xf32, #tpu.memory_space<vmem>>, %arg3: memref<8x256xf32, #tpu.memory_space<vmem>>, %arg4: memref<1x256xf32, #tpu.memory_space<vmem>>, %arg5: memref<1x128xf32, #tpu.memory_space<vmem>>, %arg6: memref<8x256xf32, #tpu.memory_space<vmem>>) attributes {dimension_semantics = [#tpu.dimension_semantics<parallel>, #tpu.dimension_semantics<arbitrary>], iteration_bounds = array<i64: 1, 1>, scalar_prefetch = 0 : i64, scratch_operands = 1 : i64, tpu.core_type = #tpu.core_type<tc>, window_params = [{transform_indices = @transform_0, window_bounds = array<i64: 8, 256>}, {transform_indices = @transform_1, window_bounds = array<i64: 8, 256>}, {pipeline_mode = #tpu.pipeline_mode<synchronous>, transform_indices = @transform_2, window_bounds = array<i64: 1, 256>}, {transform_indices = @transform_3, window_bounds = array<i64: 1, 128>}]} {
    %c0_i32 = arith.constant 0 : i32
    %0 = arith.cmpi eq, %arg1, %c0_i32 : i32
    %1 = arith.extui %0 : i1 to i32
    %c0_i32_0 = arith.constant 0 : i32
    %2 = arith.cmpi ne, %1, %c0_i32_0 : i32
    scf.if %2 {
      %cst_10 = arith.constant 0.000000e+00 : f32
      %15 = vector.broadcast %cst_10 : f32 to vector<8x256xf32>
      %c0_11 = arith.constant 0 : index
      %c0_12 = arith.constant 0 : index
      %16 = vector.load %arg6[%c0_11, %c0_12] : memref<8x256xf32, #tpu.memory_space<vmem>>, vector<8x256xf32>
      tpu.vector_store %arg6[%c0_11, %c0_12], %15 {strides = array<i32>} : memref<8x256xf32, #tpu.memory_space<vmem>>, vector<8x256xf32>,
    } else {
    }
    %c0 = arith.constant 0 : index
    %c0_1 = arith.constant 0 : index
    %3 = vector.load %arg2[%c0, %c0_1] : memref<8x256xf32, #tpu.memory_space<vmem>>, vector<8x256xf32>
    %c0_2 = arith.constant 0 : index
    %c0_3 = arith.constant 0 : index
    %4 = vector.load %arg3[%c0_2, %c0_3] : memref<8x256xf32, #tpu.memory_space<vmem>>, vector<8x256xf32>
    %5 = arith.subf %3, %4 : vector<8x256xf32>
    %6 = arith.mulf %5, %5 : vector<8x256xf32>
    %c0_4 = arith.constant 0 : index
    %c0_5 = arith.constant 0 : index
    %7 = vector.load %arg6[%c0_4, %c0_5] : memref<8x256xf32, #tpu.memory_space<vmem>>, vector<8x256xf32>
    %8 = vector.shape_cast %6 : vector<8x256xf32> to vector<1x8x256xf32>
    %cst = arith.constant dense<0.000000e+00> : vector<8x256xf32>
    %9 = vector.multi_reduction <add>, %8, %cst [0] : vector<1x8x256xf32> to vector<8x256xf32>
    %10 = arith.addf %7, %9 : vector<8x256xf32>
    %c0_6 = arith.constant 0 : index
    %c0_7 = arith.constant 0 : index
    %11 = vector.load %arg6[%c0_6, %c0_7] : memref<8x256xf32, #tpu.memory_space<vmem>>, vector<8x256xf32>
    tpu.vector_store %arg6[%c0_6, %c0_7], %10 {strides = array<i32>} : memref<8x256xf32, #tpu.memory_space<vmem>>, vector<8x256xf32>,
    %c0_i32_8 = arith.constant 0 : i32
    %12 = arith.cmpi eq, %arg1, %c0_i32_8 : i32
    %13 = arith.extui %12 : i1 to i32
    %c0_i32_9 = arith.constant 0 : i32
    %14 = arith.cmpi ne, %13, %c0_i32_9 : i32
    scf.if %14 {
      %c0_10 = arith.constant 0 : index
      %c0_11 = arith.constant 0 : index
      %15 = vector.load %arg6[%c0_10, %c0_11] : memref<8x256xf32, #tpu.memory_space<vmem>>, vector<8x256xf32>
      %cst_12 = arith.constant dense<0.000000e+00> : vector<256xf32>
      %16 = vector.multi_reduction <add>, %15, %cst_12 [0] : vector<8x256xf32> to vector<256xf32>
      %17 = vector.shape_cast %16 : vector<256xf32> to vector<1x256xf32>
      %c0_13 = arith.constant 0 : index
      %c0_14 = arith.constant 0 : index
      %18 = vector.load %arg4[%c0_13, %c0_14] : memref<1x256xf32, #tpu.memory_space<vmem>>, vector<1x256xf32>
      %19 = arith.mulf %18, %17 : vector<1x256xf32>
      %20 = vector.shape_cast %19 : vector<1x256xf32> to vector<1x1x256xf32>
      %cst_15 = arith.constant dense<0.000000e+00> : vector<1xf32>
      %21 = vector.multi_reduction <add>, %20, %cst_15 [1, 2] : vector<1x1x256xf32> to vector<1xf32>
      %22 = vector.shape_cast %21 : vector<1xf32> to vector<1x1x1xf32>
      %23 = vector.extract %22[0, 0, 0] : f32 from vector<1x1x1xf32>
      %24 = vector.broadcast %23 : f32 to vector<1x128xf32>
      %c0_16 = arith.constant 0 : index
      %c0_17 = arith.constant 0 : index
      %25 = vector.load %arg5[%c0_16, %c0_17] : memref<1x128xf32, #tpu.memory_space<vmem>>, vector<1x128xf32>
      tpu.vector_store %arg5[%c0_16, %c0_17], %24 {strides = array<i32>} : memref<1x128xf32, #tpu.memory_space<vmem>>, vector<1x128xf32>,
    } else {
    }
    return
  }
  func.func @transform_0(%arg0: i32, %arg1: i32) -> (i32, i32) {
    %c1_i32 = arith.constant 1 : i32
    %0 = arith.muli %arg0, %c1_i32 : i32
    %1 = arith.addi %0, %arg1 : i32
    %c0_i32 = arith.constant 0 : i32
    %c0_i32_0 = arith.constant 0 : i32
    return %1, %c0_i32 : i32, i32
  }
  func.func @transform_1(%arg0: i32, %arg1: i32) -> (i32, i32) {
    %c1_i32 = arith.constant 1 : i32
    %0 = arith.muli %arg0, %c1_i32 : i32
    %1 = arith.addi %0, %arg1 : i32
    %c0_i32 = arith.constant 0 : i32
    %c0_i32_0 = arith.constant 0 : i32
    return %1, %c0_i32 : i32, i32
  }
  func.func @transform_2(%arg0: i32, %arg1: i32) -> (i32, i32) {
    %c0_i32 = arith.constant 0 : i32
    %c0_i32_0 = arith.constant 0 : i32
    %c0_i32_1 = arith.constant 0 : i32
    return %c0_i32, %c0_i32_0 : i32, i32
  }
  func.func @transform_3(%arg0: i32, %arg1: i32) -> (i32, i32) {
    %c0_i32 = arith.constant 0 : i32
    %c0_i32_0 = arith.constant 0 : i32
    return %c0_i32, %arg0 : i32, i32
  }
}

</mosaic_0001>

<bundles_post_ra>
// kernel: tpu_custom_call.1
= control target key start
LH: loop header
LB: loop body
LE: loop exit
PB: predicated region body
PF: predicated region fallthrough
CT: control target
= control target key end

     0   :  { %8 = vsyncpa [#allocation4], 0  ;;  %s258_s0 = inlined_call_operand.hbm [shape: f32[8,256], index: 0, kind: input, shape index: {}]   ;;  %s259_s1 = inlined_call_operand.hbm [shape: f32[8,256], index: 1, kind: input, shape index: {}]   ;;  %s260_s2 = inlined_call_operand.vmem [shape: f32[1,256], index: 2, kind: input, shape index: {}]   ;;  %s261_s3 = inlined_call_operand.hbm [shape: f32[1,128], index: 3, kind: output, shape index: {}]  }
   0x1   :  { %9 = vsyncpa [#allocation7], 0 }
   0x2   :  { %10 = vsyncpa [#allocation5], 0  ;;  %s222_s12 = smov [#allocation3]   ;;  %s223_s14 = smov [#allocation6]  }
   0x3   :  { %s21_s13 = sshll.u32 %s222_s12, 4  ;;  %s35_s15 = sshll.u32 %s223_s14, 4  ;;  %s22_s13 = int_to_ptr.vmem [resolvable:$true] %s21_s13  ;;  %s36_s15 = int_to_ptr.vmem [resolvable:$true] %s35_s15 }
   0x4   :  { %s164_s16 = scalar_lea.vmem %s22_s13, 256  ;;  %p169_p1 = scmp.lt.s32.totalorder %s22_s13, %s22_s13 }
   0x5   :  { %p165_p0 = scmp.ne.s32.totalorder %s22_s13, %s164_s16  ;;  %p170_p2 = scmp.lt.s32.totalorder %s164_s16, %s164_s16 }
   0x7   :  { %p171_p3 = por %p170_p2, %p169_p1 }
   0x9   :  { %p172_p4 = pnand %p171_p3, %p165_p0 }
   0xb   :  { %175 = shalt.err (!%p172_p4)
}
   0xc   :  { %24 = dma.hbm_to_vmem [thread:$0]  %s258_s0, 256, %s22_s13, [#allocation4]  }
   0xd   :  { %s184_s19 = scalar_lea.vmem %s36_s15, 256  ;;  %p189_p6 = scmp.lt.s32.totalorder %s36_s15, %s36_s15 }
   0xe   :  { %p185_p5 = scmp.ne.s32.totalorder %s36_s15, %s184_s19  ;;  %p190_p7 = scmp.lt.s32.totalorder %s184_s19, %s184_s19 }
  0x10   :  { %p191_p8 = por %p190_p7, %p189_p6 }
  0x12   :  { %p192_p9 = pnand %p191_p8, %p185_p5 }
  0x14   :  { %195 = shalt.err (!%p192_p9)
}
  0x15   :  { %38 = dma.hbm_to_vmem [thread:$0]  %s259_s1, 256, %s36_s15, [#allocation7]  }
  0x16   :  { %216 = dma.done.wait [#allocation4], 256  }
  0x17   :  { %217 = vsyncadd [#allocation4], 4294967040 }
  0x18   :  { %218 = dma.done.wait [#allocation7], 256  }
  0x19   :  { %219 = vsyncadd [#allocation7], 4294967040  ;;  %v55_v0 = vld [vmem:[#allocation3] sm:$0xff]  ;;  %v56_v1 = vld [vmem:[#allocation3 + $0x8] sm:$0xff]  ;;  %v224_v12 = vmov 1966171168   ;;  %v95_v14 = vlaneseq }
  0x1a   :  { %v57_v2 = vld [vmem:[#allocation6] sm:$0xff]  ;;  %v58_v3 = vld [vmem:[#allocation6 + $0x8] sm:$0xff]  ;;  %v93_v13 = vunpack.c.l.s4 %v224_v12  ;;  %v88_v28 = vld [vmem:[%s260_s2] sm:$0x3]  ;;  %vm119_vm0 = vcmask 1040384   ;;  %s225_s2 = smov [#allocation8]  }
  0x1b   :  { %v59_v4 = vsub.f32 %v55_v0, %v57_v2  ;;  %v60_v5 = vsub.f32 %v56_v1, %v58_v3  ;;  %v96_v20 = vshrl.u32 %v95_v14, 7  ;;  %s140_s22 = sshll.u32 %s225_s2, 4  ;;  %s141_s22 = int_to_ptr.vmem [resolvable:$true] %s140_s22 }
  0x1c   :  { %v94_v19 = vunpack.c.0.s8 %v93_v13  ;;  %s196_s24 = scalar_lea.vmem %s141_s22, 16  ;;  %s200_s25 = scalar_lea.vmem %s141_s22, 32 }
  0x1d   :  { %v61_v6 = vmul.f32 %v59_v4, %v59_v4  ;;  %v62_v7 = vmul.f32 %v60_v5, %v60_v5  ;;  %v111_v30 = vsub.s32 0, %v96_v20  ;;  %v115_v31 = vsub.s32 1, %v96_v20  ;;  %p197_p10 = scmp.ne.s32.totalorder %s141_s22, %s196_s24  ;;  %p201_p11 = scmp.lt.s32.totalorder %s141_s22, %s141_s22 }
  0x1e   :  { %v97_v25 = vsub.s32 %v94_v19, %v96_v20  ;;  %p202_p12 = scmp.lt.s32.totalorder %s200_s25, %s196_s24 }
  0x1f   :  { %v76_v8 = vrot.slane %v61_v6, 4  ;;  %v82_v9 = vrot.slane %v62_v7, 4 }
  0x20   :  { %p203_p13 = por %p202_p12, %p201_p11 }
  0x21   :  { %v77_v10 = vadd.f32 %v76_v8, %v61_v6  ;;  %v83_v11 = vadd.f32 %v82_v9, %v62_v7 }
  0x22   :  { %p204_p0 = pnand %p203_p13, %p197_p10 }
  0x23   :  { %v78_v15 = vrot.slane %v77_v10, 2  ;;  %v84_v16 = vrot.slane %v83_v11, 2 }
  0x25   :  { %v79_v17 = vadd.f32 %v78_v15, %v77_v10  ;;  %v85_v18 = vadd.f32 %v84_v16, %v83_v11 }
  0x27   :  { %v80_v21 = vrot.slane %v79_v17, 1  ;;  %v86_v22 = vrot.slane %v85_v18, 1 }
  0x29   :  { %v81_v23 = vadd.f32 %v80_v21, %v79_v17  ;;  %v87_v24 = vadd.f32 %v86_v22, %v85_v18 }
  0x2b   :  { %v91_v26 = vcombine.low %v81_v23, %v87_v24 }
  0x2d   :  { %v98_v27 = vrot.slane %v91_v26, %v97_v25 }
  0x2f   :  { %v105_v29 = vrot.slane %v98_v27, %v97_v25 }
  0x31   :  { %v107_v32 = vmul.f32 %v105_v29, %v88_v28 }
  0x33   :  { %v112_v33 = vrot.slane %v107_v32, %v111_v30  ;;  %v116_v34 = vrot.slane %v107_v32, %v115_v31 }
  0x35   :  { %v120_v35 = vsel %vm119_vm0, %v112_v33, 0.0  ;;  %v121_v36 = vsel %vm119_vm0, %v116_v34, 0.0 }
  0x36   :  { %v122_v37 = vadd.f32 %v121_v36, %v120_v35 }
  0x38   :  { %123 = vadd.xlane.f32.xlu0 %v122_v37 }
  0xc1   :  { %v124_v38 = vpop.xlane.xlu0 %123 }
  0xc2   :  { %v125_v39 = vrot.slane %v124_v38, 4 }
  0xc4   :  { %v126_v40 = vadd.f32 %v125_v39, %v124_v38 }
  0xc6   :  { %v127_v41 = vrot.slane %v126_v40, 2 }
  0xc8   :  { %v128_v42 = vadd.f32 %v127_v41, %v126_v40 }
  0xca   :  { %v129_v43 = vrot.slane %v128_v42, 1 }
  0xcc   :  { %v130_v44 = vadd.f32 %v129_v43, %v128_v42 }
  0xce   :  { %150 = vpush %v130_v44 }
  0xff   :  { %s151_s23 = spop %150 }
 0x100   :  { %v132_v45 = vstv %s151_s23 }
 0x101   :  { %133 = vst [vmem:[#allocation8] sm:$0x1] %v132_v45 }
 0x102   :  { %207 = shalt.err (!%p204_p0)
}
 0x103   :  { %143 = dma.vmem_to_hbm [thread:$0]  %s141_s22, 16, %s261_s3, [#allocation5]  }
 0x104   :  { %220 = dma.done.wait [#allocation5], 16  }
 0x105   :  { %221 = vsyncadd [#allocation5], 4294967280 }
 0x106   :  { %147 = vsyncpa [#allocation4], 1 }
 0x107   :  { %148 = vsyncpa [#allocation7], 1 }
 0x108   :  { %149 = vsyncpa [#allocation5], 1 }

</bundles_post_ra>
